<compile_context>
chip_gen: v7x
topology: tpu7x:2x2x1
jax: 0.10.0
libtpu: 0.0.40
codegen_flags: <defaults>
</compile_context>

<pallas_src>
import jax
import jax.numpy as jnp
from jax.experimental import pallas as pl
from jax.experimental.pallas import tpu as pltpu


def _choose_tiling(B, *, chunk=512, target_block=4096, min_grid=4):
    """Pick (chunk, chunks_per_block, block, grid) for the batch axis.

    chunk:        inner lane-dense working chunk (multiple of 128).
    target_block: rows per grid step (amortizes ~0.35us/step overhead).
    min_grid:     keep at least this many grid steps when B allows, so the
                  "parallel" axis can shard across v7x's two TensorCores with
                  >= 2 pipelined steps per core.
    """
    chunk = max(128, (int(chunk) // 128) * 128)
    b128 = pl.cdiv(B, 128) * 128
    chunk = min(chunk, b128)
    n_chunks_total = pl.cdiv(b128, chunk)
    max_cpb = max(1, int(target_block) // chunk)
    cpb = max(1, min(max_cpb, n_chunks_total // max(1, int(min_grid))))
    cpb = min(cpb, n_chunks_total)
    block = cpb * chunk
    grid = pl.cdiv(B, block)
    return chunk, cpb, block, grid


def _make_mlp_kernel(n_par, width, n_out, num_hidden, chunk, n_chunks,
                     compute_dtype):
    """Kernel body: x_ref[B-block, n_par] -> out_ref[B-block, n_out].

    Hidden layers (with ReLU) run batch-on-lanes; the final Linear runs
    batch-major so the store is already in [B, n_out] layout.
    """

    def kernel(x_ref, w_hid_ref, b_hid_ref, w_last_ref, b_last_ref, out_ref):
        # Hoist all (tiny) weight / bias loads out of the chunk loop.
        w_hid = [w_hid_ref[li, :, : (n_par if li == 0 else width)]
                 for li in range(num_hidden)]                    # [width, d_in]
        b_hid = [b_hid_ref[li] for li in range(num_hidden)]      # [width, 1] f32
        w_last = w_last_ref[...]                                 # [in_last, n_out]
        b_last = b_last_ref[...]                                 # [1, n_out] f32

        def chunk_body(off):
            # Native-layout x chunk; relayout to batch-on-lanes in-kernel (XLU).
            xs = x_ref[pl.ds(off, chunk), :].astype(jnp.float32)  # [chunk, n_par]
            if num_hidden > 0:
                h = xs.T.astype(compute_dtype)                     # [n_par, chunk]
                z = None
                for li in range(num_hidden):
                    # [width, d_in] @ [d_in, chunk] -> [width, chunk], f32 acc.
                    z = jnp.dot(w_hid[li], h,
                                preferred_element_type=jnp.float32) + b_hid[li]
                    z = jnp.maximum(z, 0.0)                        # ReLU in f32
                    h = z.astype(compute_dtype)
                last_in = z.T                                      # [chunk, width] f32
            else:
                last_in = xs
            # Final Linear, batch-major: [chunk, in] @ [in, n_out] -> [chunk, n_out]
            out = jnp.dot(last_in.astype(compute_dtype), w_last,
                          preferred_element_type=jnp.float32) + b_last
            out_ref[pl.ds(off, chunk), :] = out.astype(out_ref.dtype)

        if n_chunks <= 8:
            # Static offsets: fully static slices, scheduler-visible unroll.
            for c in range(n_chunks):
                chunk_body(c * chunk)
        else:
            @pl.loop(0, n_chunks)
            def _(c):
                chunk_body(pl.multiple_of(c * chunk, chunk))

    return kernel


def surrogate_nn_forward(x, weights, biases, *, moment_structure=None,
                         compute_dtype=jnp.bfloat16, out_dtype=jnp.float32,
                         chunk=512, target_block=4096, min_grid=4):
    """Pallas forward pass of Surrogate_NN (whole MLP fused in one call).

    x:             [B, n_par] (any float dtype; cast to compute_dtype in-kernel)
    weights:       PyTorch-layout weights  W_i : [out_i, in_i]
    biases:        biases                  b_i : [out_i]
    compute_dtype: MXU input dtype (bf16 default = native-rate MXU on
                   v5e/v6e/v7x, f32 accumulation; pass jnp.float32 for full f32)
    Returns [B, n_out] in out_dtype, or a dict of column slices if
    moment_structure is given (mirrors the PyTorch module).
    """
    x = jnp.asarray(x)
    B, n_par = x.shape
    L = len(weights)
    num_hidden = L - 1
    n_out = int(weights[-1].shape[0])
    width = int(weights[0].shape[0]) if num_hidden > 0 else n_par
    for li in range(num_hidden):
        assert int(weights[li].shape[0]) == width, (
            "Surrogate_NN uses a constant nn_width for all hidden layers")
    max_in = max(n_par, width)

    # ---- pack parameters into a few constant-index operands (tiny, one-off) --
    if num_hidden > 0:
        w_hid = jnp.zeros((num_hidden, width, max_in), compute_dtype)
        b_hid = jnp.zeros((num_hidden, width, 1), jnp.float32)
        for li in range(num_hidden):
            w = jnp.asarray(weights[li], jnp.float32)
            w_hid = w_hid.at[li, :, : w.shape[1]].set(w.astype(compute_dtype))
            b_hid = b_hid.at[li, :, 0].set(jnp.asarray(biases[li], jnp.float32))
    else:  # not reachable for Surrogate_NN (nn_num_layers >= 1); placeholders
        w_hid = jnp.zeros((1, 1, 1), compute_dtype)
        b_hid = jnp.zeros((1, 1, 1), jnp.float32)
    w_last = jnp.asarray(weights[-1], jnp.float32).T.astype(compute_dtype)
    b_last = jnp.asarray(biases[-1], jnp.float32).reshape(1, n_out)

    chunk_, cpb, block, grid = _choose_tiling(
        B, chunk=chunk, target_block=target_block, min_grid=min_grid)

    kernel = _make_mlp_kernel(n_par, width, n_out, num_hidden,
                              chunk_, cpb, compute_dtype)

    in_specs = [
        pl.BlockSpec((block, n_par), lambda i: (i, 0)),     # x, native layout
        pl.BlockSpec(w_hid.shape, lambda i: (0, 0, 0)),     # packed hidden W
        pl.BlockSpec(b_hid.shape, lambda i: (0, 0, 0)),     # packed hidden b (cols)
        pl.BlockSpec(w_last.shape, lambda i: (0, 0)),       # last W, pre-transposed
        pl.BlockSpec(b_last.shape, lambda i: (0, 0)),       # last b (row)
    ]
    out_specs = pl.BlockSpec((block, n_out), lambda i: (i, 0))

    out = pl.pallas_call(
        kernel,
        out_shape=jax.ShapeDtypeStruct((B, n_out), out_dtype),
        grid_spec=pltpu.PrefetchScalarGridSpec(
            num_scalar_prefetch=0,
            grid=(grid,),
            in_specs=in_specs,
            out_specs=out_specs,
        ),
        compiler_params=pltpu.CompilerParams(
            dimension_semantics=("parallel",),
            # Narrow (n_par / n_out) last dims lane-pad in VMEM; usage at the
            # default block=4096 is ~8 MiB double-buffered -- well under the
            # 32 MiB cap on every generation (v7x physical VMEM is 64 MiB).
            vmem_limit_bytes=32 * 1024 * 1024,
        ),
    )(x, w_hid, b_hid, w_last, b_last)

    if moment_structure is None:
        return out
    # Dict-of-column-slices, mirroring {k: output[:, v] for k, v in ...}
    return {k: out[:, v] for k, v in moment_structure.items()}


def init_surrogate_params(key, n_par, n_out, nn_width=32, nn_num_layers=4):
    """Synthetic init matching Surrogate_NN.__init__ layer shapes."""
    dims = [n_par] + [nn_width] * nn_num_layers + [n_out]
    weights, biases = [], []
    for li in range(len(dims) - 1):
        fan_in, fan_out = dims[li], dims[li + 1]
        key, kw, kb = jax.random.split(key, 3)
        if li < nn_num_layers:
            std = (2.0 / (fan_in + fan_out)) ** 0.5        # xavier_normal_
        else:
            std = 1.0 / (fan_in ** 0.5)                    # default-ish last layer
        w = std * jax.random.normal(kw, (fan_out, fan_in), jnp.float32)
        bound = 1.0 / (fan_in ** 0.5)
        b = jax.random.uniform(kb, (fan_out,), jnp.float32, -bound, bound)
        weights.append(w)
        biases.append(b)
    return weights, biases


def _reference_forward(x, weights, biases):
    h = jnp.asarray(x, jnp.float32)
    for li, (w, b) in enumerate(zip(weights, biases)):
        h = h @ jnp.asarray(w, jnp.float32).T + jnp.asarray(b, jnp.float32)
        if li != len(weights) - 1:
            h = jnp.maximum(h, 0.0)
    return h


if __name__ == "__main__":
    # Small shapes consistent with the module: X is [batch, n_par].
    B, n_par, n_out = 16, 8, 16
    nn_width, nn_num_layers = 32, 4

    key = jax.random.PRNGKey(0)
    key, kx = jax.random.split(key)
    x = jax.random.normal(kx, (B, n_par), jnp.float32)

    weights, biases = init_surrogate_params(
        key, n_par, n_out, nn_width=nn_width, nn_num_layers=nn_num_layers)
    ref = _reference_forward(x, weights, biases)

    # 1) f32 compute path, single block.
    out = jax.block_until_ready(
        surrogate_nn_forward(x, weights, biases, compute_dtype=jnp.float32))
    assert out.shape == (B, n_out)
    assert jnp.allclose(out, ref, atol=2e-2, rtol=2e-2), "mismatch (f32)"

    # 2) Default bf16 MXU path, ragged batch (B not a multiple of 128);
    #    boundary-block padding handles the edge, no wrapper pad/transpose.
    B2 = 300
    key, kx2 = jax.random.split(key)
    x2 = jax.random.normal(kx2, (B2, n_par), jnp.float32)
    out2 = jax.block_until_ready(surrogate_nn_forward(x2, weights, biases))
    ref2 = _reference_forward(x2, weights, biases)
    assert out2.shape == (B2, n_out)
    assert jnp.allclose(out2, ref2, atol=1e-1, rtol=1e-1), "mismatch (bf16)"

    # 3) Multi-step grid + in-kernel chunk loop (4 chunks / step) + ragged edge.
    B3 = 600
    key, kx3 = jax.random.split(key)
    x3 = jax.random.normal(kx3, (B3, n_par), jnp.float32)
    out3 = jax.block_until_ready(
        surrogate_nn_forward(x3, weights, biases, compute_dtype=jnp.float32,
                             chunk=128, target_block=512, min_grid=1))
    ref3 = _reference_forward(x3, weights, biases)
    assert out3.shape == (B3, n_out)
    assert jnp.allclose(out3, ref3, atol=2e-2, rtol=2e-2), "mismatch (chunked)"

    # 4) moment_structure dict path (plain-JAX column slices over kernel output).
    ms = {"m0": slice(0, 4), "m1": slice(4, n_out)}
    out_d = surrogate_nn_forward(x, weights, biases, compute_dtype=jnp.float32,
                                 moment_structure=ms)
    jax.block_until_ready(out_d["m0"])
    assert out_d["m0"].shape == (B, 4) and out_d["m1"].shape == (B, n_out - 4)

    # TODO(synk): .to(device) / .detach().numpy() host glue from forward() is
    # framework plumbing with no TPU-kernel equivalent.
    print("KERNEL_OK")
</pallas_src>

<mosaic_0001>
module attributes {stable_mosaic.version = 11 : i64} {
  func.func @kernel(%arg0: i32, %arg1: memref<128x8xf32, #tpu.memory_space<vmem>>, %arg2: memref<4x32x32xf32, #tpu.memory_space<vmem>>, %arg3: memref<4x32x1xf32, #tpu.memory_space<vmem>>, %arg4: memref<32x16xf32, #tpu.memory_space<vmem>>, %arg5: memref<1x16xf32, #tpu.memory_space<vmem>>, %arg6: memref<128x16xf32, #tpu.memory_space<vmem>>) attributes {dimension_semantics = [#tpu.dimension_semantics<parallel>], iteration_bounds = array<i64: 1>, scalar_prefetch = 0 : i64, scratch_operands = 0 : i64, tpu.core_type = #tpu.core_type<tc>, window_params = [{transform_indices = @transform_0, window_bounds = array<i64: 128, 8>}, {pipeline_mode = #tpu.pipeline_mode<synchronous>, transform_indices = @transform_1, window_bounds = array<i64: 4, 32, 32>}, {pipeline_mode = #tpu.pipeline_mode<synchronous>, transform_indices = @transform_2, window_bounds = array<i64: 4, 32, 1>}, {pipeline_mode = #tpu.pipeline_mode<synchronous>, transform_indices = @transform_3, window_bounds = array<i64: 32, 16>}, {pipeline_mode = #tpu.pipeline_mode<synchronous>, transform_indices = @transform_4, window_bounds = array<i64: 1, 16>}, {transform_indices = @transform_5, window_bounds = array<i64: 128, 16>}]} {
    %c0 = arith.constant 0 : index
    %c0_0 = arith.constant 0 : index
    %c0_1 = arith.constant 0 : index
    %0 = vector.load %arg2[%c0, %c0_0, %c0_1] : memref<4x32x32xf32, #tpu.memory_space<vmem>>, vector<1x32x8xf32>
    %1 = vector.shape_cast %0 : vector<1x32x8xf32> to vector<32x8xf32>
    %c1 = arith.constant 1 : index
    %c0_2 = arith.constant 0 : index
    %c0_3 = arith.constant 0 : index
    %2 = vector.load %arg2[%c1, %c0_2, %c0_3] : memref<4x32x32xf32, #tpu.memory_space<vmem>>, vector<1x32x32xf32>
    %3 = vector.shape_cast %2 : vector<1x32x32xf32> to vector<32x32xf32>
    %c2 = arith.constant 2 : index
    %c0_4 = arith.constant 0 : index
    %c0_5 = arith.constant 0 : index
    %4 = vector.load %arg2[%c2, %c0_4, %c0_5] : memref<4x32x32xf32, #tpu.memory_space<vmem>>, vector<1x32x32xf32>
    %5 = vector.shape_cast %4 : vector<1x32x32xf32> to vector<32x32xf32>
    %c3 = arith.constant 3 : index
    %c0_6 = arith.constant 0 : index
    %c0_7 = arith.constant 0 : index
    %6 = vector.load %arg2[%c3, %c0_6, %c0_7] : memref<4x32x32xf32, #tpu.memory_space<vmem>>, vector<1x32x32xf32>
    %7 = vector.shape_cast %6 : vector<1x32x32xf32> to vector<32x32xf32>
    %c0_8 = arith.constant 0 : index
    %c0_9 = arith.constant 0 : index
    %c0_10 = arith.constant 0 : index
    %8 = vector.load %arg3[%c0_8, %c0_9, %c0_10] : memref<4x32x1xf32, #tpu.memory_space<vmem>>, vector<1x32x1xf32>
    %9 = vector.shape_cast %8 : vector<1x32x1xf32> to vector<32x1xf32>
    %c1_11 = arith.constant 1 : index
    %c0_12 = arith.constant 0 : index
    %c0_13 = arith.constant 0 : index
    %10 = vector.load %arg3[%c1_11, %c0_12, %c0_13] : memref<4x32x1xf32, #tpu.memory_space<vmem>>, vector<1x32x1xf32>
    %11 = vector.shape_cast %10 : vector<1x32x1xf32> to vector<32x1xf32>
    %c2_14 = arith.constant 2 : index
    %c0_15 = arith.constant 0 : index
    %c0_16 = arith.constant 0 : index
    %12 = vector.load %arg3[%c2_14, %c0_15, %c0_16] : memref<4x32x1xf32, #tpu.memory_space<vmem>>, vector<1x32x1xf32>
    %13 = vector.shape_cast %12 : vector<1x32x1xf32> to vector<32x1xf32>
    %c3_17 = arith.constant 3 : index
    %c0_18 = arith.constant 0 : index
    %c0_19 = arith.constant 0 : index
    %14 = vector.load %arg3[%c3_17, %c0_18, %c0_19] : memref<4x32x1xf32, #tpu.memory_space<vmem>>, vector<1x32x1xf32>
    %15 = vector.shape_cast %14 : vector<1x32x1xf32> to vector<32x1xf32>
    %c0_20 = arith.constant 0 : index
    %c0_21 = arith.constant 0 : index
    %16 = vector.load %arg4[%c0_20, %c0_21] : memref<32x16xf32, #tpu.memory_space<vmem>>, vector<32x16xf32>
    %c0_22 = arith.constant 0 : index
    %c0_23 = arith.constant 0 : index
    %17 = vector.load %arg5[%c0_22, %c0_23] : memref<1x16xf32, #tpu.memory_space<vmem>>, vector<1x16xf32>
    %c0_24 = arith.constant 0 : index
    %c0_25 = arith.constant 0 : index
    %18 = vector.load %arg1[%c0_24, %c0_25] : memref<128x8xf32, #tpu.memory_space<vmem>>, vector<128x8xf32>
    %19 = tpu.transpose %18, [1, 0] : vector<128x8xf32> -> vector<8x128xf32>
    %cst = arith.constant dense<0.000000e+00> : vector<32x128xf32>
    %20 = tpu.matmul %1, %19, %cst {dimension_numbers = #tpu.dot_dimension_numbers<[1], [0], [0], [1], [0, 0, 1, 1], [], []>} : vector<32x8xf32>, vector<8x128xf32>, vector<32x128xf32> -> vector<32x128xf32>
    %21 = vector.broadcast %9 : vector<32x1xf32> to vector<32x128xf32>
    %22 = arith.addf %20, %21 : vector<32x128xf32>
    %cst_26 = arith.constant 0.000000e+00 : f32
    %23 = vector.broadcast %cst_26 : f32 to vector<32x128xf32>
    %24 = arith.maximumf %22, %23 : vector<32x128xf32>
    %cst_27 = arith.constant dense<0.000000e+00> : vector<32x128xf32>
    %25 = tpu.matmul %3, %24, %cst_27 {dimension_numbers = #tpu.dot_dimension_numbers<[1], [0], [0], [1], [0, 0, 1, 1], [], []>} : vector<32x32xf32>, vector<32x128xf32>, vector<32x128xf32> -> vector<32x128xf32>
    %26 = vector.broadcast %11 : vector<32x1xf32> to vector<32x128xf32>
    %27 = arith.addf %25, %26 : vector<32x128xf32>
    %cst_28 = arith.constant 0.000000e+00 : f32
    %28 = vector.broadcast %cst_28 : f32 to vector<32x128xf32>
    %29 = arith.maximumf %27, %28 : vector<32x128xf32>
    %cst_29 = arith.constant dense<0.000000e+00> : vector<32x128xf32>
    %30 = tpu.matmul %5, %29, %cst_29 {dimension_numbers = #tpu.dot_dimension_numbers<[1], [0], [0], [1], [0, 0, 1, 1], [], []>} : vector<32x32xf32>, vector<32x128xf32>, vector<32x128xf32> -> vector<32x128xf32>
    %31 = vector.broadcast %13 : vector<32x1xf32> to vector<32x128xf32>
    %32 = arith.addf %30, %31 : vector<32x128xf32>
    %cst_30 = arith.constant 0.000000e+00 : f32
    %33 = vector.broadcast %cst_30 : f32 to vector<32x128xf32>
    %34 = arith.maximumf %32, %33 : vector<32x128xf32>
    %cst_31 = arith.constant dense<0.000000e+00> : vector<32x128xf32>
    %35 = tpu.matmul %7, %34, %cst_31 {dimension_numbers = #tpu.dot_dimension_numbers<[1], [0], [0], [1], [0, 0, 1, 1], [], []>} : vector<32x32xf32>, vector<32x128xf32>, vector<32x128xf32> -> vector<32x128xf32>
    %36 = vector.broadcast %15 : vector<32x1xf32> to vector<32x128xf32>
    %37 = arith.addf %35, %36 : vector<32x128xf32>
    %cst_32 = arith.constant 0.000000e+00 : f32
    %38 = vector.broadcast %cst_32 : f32 to vector<32x128xf32>
    %39 = arith.maximumf %37, %38 : vector<32x128xf32>
    %40 = tpu.transpose %39, [1, 0] : vector<32x128xf32> -> vector<128x32xf32>
    %cst_33 = arith.constant dense<0.000000e+00> : vector<128x16xf32>
    %41 = tpu.matmul %40, %16, %cst_33 {dimension_numbers = #tpu.dot_dimension_numbers<[1], [0], [0], [1], [0, 0, 1, 1], [], []>} : vector<128x32xf32>, vector<32x16xf32>, vector<128x16xf32> -> vector<128x16xf32>
    %42 = vector.broadcast %17 : vector<1x16xf32> to vector<128x16xf32>
    %43 = arith.addf %41, %42 : vector<128x16xf32>
    %c0_34 = arith.constant 0 : index
    %c0_35 = arith.constant 0 : index
    %44 = vector.load %arg6[%c0_34, %c0_35] : memref<128x16xf32, #tpu.memory_space<vmem>>, vector<128x16xf32>
    tpu.vector_store %arg6[%c0_34, %c0_35], %43 {strides = array<i32>} : memref<128x16xf32, #tpu.memory_space<vmem>>, vector<128x16xf32>,
    return
  }
  func.func @transform_0(%arg0: i32) -> (i32, i32) {
    %c0_i32 = arith.constant 0 : i32
    %c0_i32_0 = arith.constant 0 : i32
    return %arg0, %c0_i32 : i32, i32
  }
  func.func @transform_1(%arg0: i32) -> (i32, i32, i32) {
    %c0_i32 = arith.constant 0 : i32
    %c0_i32_0 = arith.constant 0 : i32
    %c0_i32_1 = arith.constant 0 : i32
    %c0_i32_2 = arith.constant 0 : i32
    return %c0_i32, %c0_i32_0, %c0_i32_1 : i32, i32, i32
  }
  func.func @transform_2(%arg0: i32) -> (i32, i32, i32) {
    %c0_i32 = arith.constant 0 : i32
    %c0_i32_0 = arith.constant 0 : i32
    %c0_i32_1 = arith.constant 0 : i32
    %c0_i32_2 = arith.constant 0 : i32
    return %c0_i32, %c0_i32_0, %c0_i32_1 : i32, i32, i32
  }
  func.func @transform_3(%arg0: i32) -> (i32, i32) {
    %c0_i32 = arith.constant 0 : i32
    %c0_i32_0 = arith.constant 0 : i32
    %c0_i32_1 = arith.constant 0 : i32
    return %c0_i32, %c0_i32_0 : i32, i32
  }
  func.func @transform_4(%arg0: i32) -> (i32, i32) {
    %c0_i32 = arith.constant 0 : i32
    %c0_i32_0 = arith.constant 0 : i32
    %c0_i32_1 = arith.constant 0 : i32
    return %c0_i32, %c0_i32_0 : i32, i32
  }
  func.func @transform_5(%arg0: i32) -> (i32, i32) {
    %c0_i32 = arith.constant 0 : i32
    %c0_i32_0 = arith.constant 0 : i32
    return %arg0, %c0_i32 : i32, i32
  }
}

</mosaic_0001>

<bundles_post_ra>
// kernel: tpu_custom_call.1
= control target key start
LH: loop header
LB: loop body
LE: loop exit
PB: predicated region body
PF: predicated region fallthrough
CT: control target
= control target key end

     0   :  { %10 = vsyncpa [#allocation3], 0  ;;  %vm100_vm0 = vcmask 64512   ;;  %v1238_v6 = vmov 0   ;;  %vm270_vm2 = vcmask 261120   ;;  %vm845_vm3 = vcmask 130048   ;;  %s1529_s0 = inlined_call_operand.vmem [shape: f32[16,8], index: 0, kind: input, shape index: {}]   ;;  %s1530_s1 = inlined_call_operand.vmem [shape: f32[4,32,32], index: 1, kind: input, shape index: {}]   ;;  %s1531_s2 = inlined_call_operand.vmem [shape: f32[4,32,1], index: 2, kind: input, shape index: {}]   ;;  %s1532_s3 = inlined_call_operand.vmem [shape: f32[32,16], index: 3, kind: input, shape index: {}]   ;;  %s1533_s4 = inlined_call_operand.vmem [shape: f32[1,16], index: 4, kind: input, shape index: {}]   ;;  %s1534_s5 = inlined_call_operand.hbm [shape: f32[16,16], index: 5, kind: output, shape index: {}]  }
   0x1   :  { %v64_v0 = vld [vmem:[%s1529_s0] sm:$0xff]  ;;  %v65_v1 = vld [vmem:[%s1529_s0 + $0x8] sm:$0xff]  ;;  %vm1280_vm1 = vmpackc.low %vm100_vm0, %vm100_vm0  ;;  %1212 = vset.pattern.permute.xlu0 %v1238_v6  ;;  %1213 = vset.pattern.permute.xlu1 %v1238_v6 }
   0x2   :  { %v1127_v2 = vpack.c.bf16 %v65_v1, %v64_v0  ;;  %v66_v4 = vld [vmem:[%s1529_s0 + $0x10] sm:$0xff]  ;;  %v67_v5 = vld [vmem:[%s1529_s0 + $0x18] sm:$0xff]  ;;  %v68_v8 = vld [vmem:[%s1529_s0 + $0x20] sm:$0xff] }
   0x3   :  { %v1133_v7 = vpack.c.bf16 %v67_v5, %v66_v4  ;;  %v69_v9 = vld [vmem:[%s1529_s0 + $0x28] sm:$0xff]  ;;  %v21_v10 = vld [vmem:[%s1530_s1] sm:$0xff]  ;;  %v42_v12 = vld [vmem:[%s1531_s2 + $0x10] sm:$0xff] }
   0x4   :  { %1129 = vmatprep.subr.msk.bf16.mxu0 %vm1280_vm1, %v1127_v2  ;;  %1047 = vmatprep.mubr.msk.f32.mxu0 %vm100_vm0, %v21_v10  ;;  %v40_v11 = vld [vmem:[%s1531_s2] sm:$0xff]  ;;  %v1139_v13 = vpack.c.bf16 %v69_v9, %v68_v8  ;;  %v41_v14 = vld [vmem:[%s1531_s2 + $0x8] sm:$0xff]  ;;  %v43_v15 = vld [vmem:[%s1531_s2 + $0x18] sm:$0xff] }
   0x5   :  { %1132 = vmatpush3.bf16.xpose.msk.msra.mxu0 %vm1280_vm1, %v1127_v2  ;;  %82 = vperm.xlu0 %1212, %v40_v11   ;;  %v890_v16 = vld [vmem:[%s1531_s2 + $0x20] sm:$0xff]  ;;  %v70_v17 = vld [vmem:[%s1529_s0 + $0x30] sm:$0xff]  ;;  %v71_v18 = vld [vmem:[%s1529_s0 + $0x38] sm:$0xff] }
   0x6   :  { %1135 = vmatprep.subr.msk.bf16.mxu0 %vm1280_vm1, %v1133_v7  ;;  %92 = vperm.xlu1 %1213, %v42_v12   ;;  %v891_v19 = vld [vmem:[%s1531_s2 + $0x28] sm:$0xff]  ;;  %v1145_v20 = vpack.c.bf16 %v71_v18, %v70_v17  ;;  %v892_v21 = vld [vmem:[%s1531_s2 + $0x30] sm:$0xff]  ;;  %v893_v22 = vld [vmem:[%s1531_s2 + $0x38] sm:$0xff] }
   0x7   :  { %v894_v23 = vld [vmem:[%s1531_s2 + $0x40] sm:$0xff]  ;;  %v73_v25 = vld [vmem:[%s1529_s0 + $0x48] sm:$0xff]  ;;  %v896_v28 = vld [vmem:[%s1531_s2 + $0x50] sm:$0xff] }
   0x8   :  { %v72_v24 = vld [vmem:[%s1529_s0 + $0x40] sm:$0xff]  ;;  %v895_v26 = vld [vmem:[%s1531_s2 + $0x48] sm:$0xff]  ;;  %v897_v29 = vld [vmem:[%s1531_s2 + $0x58] sm:$0xff] }
   0x9   :  { %87 = vperm.xlu0 %1212, %v41_v14   ;;  %v1151_v27 = vpack.c.bf16 %v73_v25, %v72_v24  ;;  %v898_v30 = vld [vmem:[%s1531_s2 + $0x60] sm:$0xff]  ;;  %v74_v31 = vld [vmem:[%s1529_s0 + $0x50] sm:$0xff]  ;;  %v75_v32 = vld [vmem:[%s1529_s0 + $0x58] sm:$0xff] }
   0xa   :  { %97 = vperm.xlu1 %1213, %v43_v15   ;;  %v899_v33 = vld [vmem:[%s1531_s2 + $0x68] sm:$0xff]  ;;  %v1157_v34 = vpack.c.bf16 %v75_v32, %v74_v31  ;;  %v900_v35 = vld [vmem:[%s1531_s2 + $0x70] sm:$0xff]  ;;  %v901_v36 = vld [vmem:[%s1531_s2 + $0x78] sm:$0xff] }
   0xb   :  { %v76_v37 = vld [vmem:[%s1529_s0 + $0x60] sm:$0xff]  ;;  %v77_v38 = vld [vmem:[%s1529_s0 + $0x68] sm:$0xff]  ;;  %v78_v40 = vld [vmem:[%s1529_s0 + $0x70] sm:$0xff] }
   0xc   :  { %v1163_v39 = vpack.c.bf16 %v77_v38, %v76_v37  ;;  %v79_v41 = vld [vmem:[%s1529_s0 + $0x78] sm:$0xff]  ;;  %v22_v43 = vld [vmem:[%s1530_s1 + $0x8] sm:$0xff]  ;;  %v23_v44 = vld [vmem:[%s1530_s1 + $0x10] sm:$0xff] }
   0xd   :  { %1138 = vmatpush3.bf16.xpose.msk.msra.mxu0 %vm1280_vm1, %v1133_v7  ;;  %252 = vperm.xlu0 %1212, %v890_v16   ;;  %v1169_v42 = vpack.c.bf16 %v79_v41, %v78_v40  ;;  %v24_v45 = vld [vmem:[%s1530_s1 + $0x18] sm:$0xff]  ;;  %v878_v46 = vld [vmem:[%s1530_s1 + $0x20] sm:$0xff]  ;;  %v879_v1 = vld [vmem:[%s1530_s1 + $0x28] sm:$0xff] }
   0xe   :  { %1141 = vmatprep.subr.msk.bf16.mxu0 %vm1280_vm1, %v1139_v13  ;;  %257 = vperm.xlu1 %1213, %v891_v19   ;;  %v880_v2 = vld [vmem:[%s1530_s1 + $0x30] sm:$0xff]  ;;  %v881_v3 = vld [vmem:[%s1530_s1 + $0x38] sm:$0xff]  ;;  %v882_v4 = vld [vmem:[%s1530_s1 + $0x40] sm:$0xff] }
   0xf   :  { %1061 = vmatprep.mubr.msk.f32.mxu1 %vm270_vm2, %v878_v46  ;;  %v884_v24 = vld [vmem:[%s1530_s1 + $0x50] sm:$0xff]  ;;  %v885_v25 = vld [vmem:[%s1530_s1 + $0x58] sm:$0xff] }
  0x10   :  { %v888_v46 = vld [vmem:[%s1530_s1 + $0x70] sm:$0xff] }
  0x11   :  { %262 = vperm.xlu0 %1212, %v892_v21  }
  0x12   :  { %267 = vperm.xlu1 %1213, %v893_v22  }
  0x15   :  { %1144 = vmatpush3.bf16.xpose.msk.msra.mxu0 %vm1280_vm1, %v1139_v13  ;;  %374 = vperm.xlu0 %1212, %v894_v23   ;;  %v883_v23 = vld [vmem:[%s1530_s1 + $0x48] sm:$0xff] }
  0x16   :  { %1147 = vmatprep.subr.msk.bf16.mxu0 %vm1280_vm1, %v1145_v20  ;;  %379 = vperm.xlu1 %1213, %v895_v26   ;;  %v886_v26 = vld [vmem:[%s1530_s1 + $0x60] sm:$0xff] }
  0x19   :  { %384 = vperm.xlu0 %1212, %v896_v28  }
  0x1a   :  { %389 = vperm.xlu1 %1213, %v897_v29  }
  0x1d   :  { %1150 = vmatpush3.bf16.xpose.msk.msra.mxu0 %vm1280_vm1, %v1145_v20  ;;  %495 = vperm.xlu0 %1212, %v898_v30  }
  0x1e   :  { %1153 = vmatprep.subr.msk.bf16.mxu0 %vm1280_vm1, %v1151_v27  ;;  %500 = vperm.xlu1 %1213, %v899_v33  }
  0x21   :  { %505 = vperm.xlu0 %1212, %v900_v35  }
  0x22   :  { %510 = vperm.xlu1 %1213, %v901_v36  }
  0x25   :  { %1156 = vmatpush3.bf16.xpose.msk.msra.mxu0 %vm1280_vm1, %v1151_v27 }
  0x26   :  { %1159 = vmatprep.subr.msk.bf16.mxu0 %vm1280_vm1, %v1157_v34 }
  0x2d   :  { %1162 = vmatpush3.bf16.xpose.msk.msra.mxu0 %vm1280_vm1, %v1157_v34 }
  0x2e   :  { %1165 = vmatprep.subr.msk.bf16.mxu0 %vm1280_vm1, %v1163_v39 }
  0x35   :  { %1168 = vmatpush3.bf16.xpose.msk.msra.mxu0 %vm1280_vm1, %v1163_v39 }
  0x36   :  { %1171 = vmatprep.subr.msk.bf16.mxu0 %vm1280_vm1, %v1169_v42 }
  0x3d   :  { %1174 = vmatpush3.bf16.xpose.msk.msra.mxu0 %vm1280_vm1, %v1169_v42 }
  0x44   :  { %1048 = vmatmul.mubr.msk.f32.vlgmr.msra.gmra.mrb[0].mxu0 %vm100_vm0, %v22_v43 }
  0x45   :  { %1050 = vmatprep.mubr.msk.f32.mxu0 %vm100_vm0, %v23_v44 }
  0x48   :  { %1051 = vmatmul.mubr.msk.f32.gmra.mrb[2].mxu0 %vm100_vm0, %v24_v45  ;;  %v887_v45 = vld [vmem:[%s1530_s1 + $0x68] sm:$0xff] }
  0x84   :  { %v83_v47 = vpop.permute.xlu0 %82 }
  0x85   :  { %v93_v48 = vpop.permute.xlu1 %92 }
  0x88   :  { %v88_v49 = vpop.permute.xlu0 %87 }
  0x89   :  { %v98_v55 = vpop.permute.xlu1 %97 }
  0x8c   :  { %v253_v6 = vpop.permute.xlu0 %252 }
  0x8d   :  { %v258_v5 = vpop.permute.xlu1 %257 }
  0x90   :  { %v263_v15 = vpop.permute.xlu0 %262 }
  0x91   :  { %v268_v12 = vpop.permute.xlu1 %267 }
  0x94   :  { %v375_v28 = vpop.permute.xlu0 %374 }
  0x95   :  { %v380_v27 = vpop.permute.xlu1 %379 }
  0x98   :  { %v385_v37 = vpop.permute.xlu0 %384 }
  0x99   :  { %v390_v34 = vpop.permute.xlu1 %389 }
 0x117   :  { %v1049_v50 = vpop.f32.mrb[0].mxu0 }
 0x118   :  { %v233_v51 = vadd.f32 %v1049_v50, %v88_v49  ;;  %v227_v52 = vpop.f32.mrb[1].mxu0  ;;  %v60_v49 = vld [vmem:[%s1532_s3 + $0x8] sm:$0xff] }
 0x119   :  { %v228_v53 = vadd.f32 %v227_v52, %v83_v47  ;;  %v889_v47 = vld [vmem:[%s1530_s1 + $0x78] sm:$0xff]  ;;  %v496_v52 = vpop.permute.xlu0 %495 }
 0x11a   :  { %v247_v54 = vmax.f32 %v233_v51, 0.0 }
 0x11b   :  { %v246_v56 = vmax.f32 %v228_v53, 0.0  ;;  %v1052_v57 = vpop.f32.mrb[2].mxu0 }
 0x11c   :  { %v243_v58 = vadd.f32 %v1052_v57, %v98_v55  ;;  %v237_v59 = vpop.f32.mrb[3].mxu0  ;;  %v501_v55 = vpop.permute.xlu1 %500 }
 0x11d   :  { %v238_v60 = vadd.f32 %v237_v59, %v93_v48  ;;  %v1175_v61 = vpack.c.bf16 %v247_v54, %v246_v56  ;;  %v59_v48 = vld [vmem:[%s1532_s3] sm:$0xff]  ;;  %v61_v59 = vld [vmem:[%s1532_s3 + $0x10] sm:$0xff] }
 0x11e   :  { %v249_v62 = vmax.f32 %v243_v58, 0.0  ;;  %v1199_v50 = vpack.c.bf16 %v60_v49, %v59_v48 }
 0x11f   :  { %v248_v63 = vmax.f32 %v238_v60, 0.0  ;;  %1176 = vmatprep.subr.bf16.mxu1 %v1175_v61  ;;  %v62_v60 = vld [vmem:[%s1532_s3 + $0x18] sm:$0xff] }
 0x120   :  { %1178 = vmatpush3.bf16.msra.mxu1 %v1175_v61 }
 0x121   :  { %v1179_v0 = vpack.c.bf16 %v249_v62, %v248_v63  ;;  %v1203_v62 = vpack.c.bf16 %v62_v60, %v61_v59  ;;  %v506_v63 = vpop.permute.xlu0 %505 }
 0x123   :  { %1180 = vmatprep.subr.bf16.mxu1 %v1179_v0 }
 0x124   :  { %1182 = vmatpush3.bf16.msra.mxu1 %v1179_v0 }
 0x127   :  { %1062 = vmatmul.mubr.msk.f32.vlgmr.msra.gmra.mrb[0].mxu1 %vm270_vm2, %v879_v1 }
 0x128   :  { %1064 = vmatprep.mubr.msk.f32.mxu1 %vm270_vm2, %v880_v2  ;;  %v511_v2 = vpop.permute.xlu1 %510 }
 0x12b   :  { %1065 = vmatmul.mubr.msk.f32.gmra.mrb[2].mxu1 %vm270_vm2, %v881_v3 }
 0x12c   :  { %1075 = vmatprep.mubr.msk.f32.mxu1 %vm270_vm2, %v882_v4 }
 0x1fa   :  { %v1063_v7 = vpop.f32.mrb[0].mxu1 }
 0x1fb   :  { %v355_v8 = vadd.f32 %v1063_v7, %v258_v5  ;;  %v349_v9 = vpop.f32.mrb[1].mxu1 }
 0x1fc   :  { %v350_v10 = vadd.f32 %v349_v9, %v253_v6 }
 0x1fd   :  { %v369_v11 = vmax.f32 %v355_v8, 0.0 }
 0x1fe   :  { %v368_v13 = vmax.f32 %v350_v10, 0.0  ;;  %v1066_v14 = vpop.f32.mrb[2].mxu1 }
 0x1ff   :  { %v365_v16 = vadd.f32 %v1066_v14, %v268_v12  ;;  %v359_v17 = vpop.f32.mrb[3].mxu1 }
 0x200   :  { %v1183_v18 = vpack.c.bf16 %v369_v11, %v368_v13  ;;  %v360_v19 = vadd.f32 %v359_v17, %v263_v15 }
 0x201   :  { %v371_v20 = vmax.f32 %v365_v16, 0.0 }
 0x202   :  { %v370_v21 = vmax.f32 %v360_v19, 0.0  ;;  %1184 = vmatprep.subr.bf16.mxu1 %v1183_v18 }
 0x203   :  { %1186 = vmatpush3.bf16.msra.mxu1 %v1183_v18 }
 0x204   :  { %v1187_v22 = vpack.c.bf16 %v371_v20, %v370_v21 }
 0x206   :  { %1188 = vmatprep.subr.bf16.mxu1 %v1187_v22 }
 0x207   :  { %1190 = vmatpush3.bf16.msra.mxu1 %v1187_v22  ;;  %v934_v22 = vld [vmem:[%s1533_s4] ss:$0 sm:$0xff] }
 0x20a   :  { %1076 = vmatmul.mubr.msk.f32.vlgmr.msra.gmra.mrb[4].mxu1 %vm270_vm2, %v883_v23 }
 0x20b   :  { %1078 = vmatprep.mubr.msk.f32.mxu1 %vm270_vm2, %v884_v24 }
 0x20e   :  { %1079 = vmatmul.mubr.msk.f32.gmra.mrb[6].mxu1 %vm270_vm2, %v885_v25 }
 0x20f   :  { %1089 = vmatprep.mubr.msk.f32.mxu1 %vm270_vm2, %v886_v26 }
 0x2dd   :  { %v1077_v29 = vpop.f32.mrb[4].mxu1 }
 0x2de   :  { %v476_v30 = vadd.f32 %v1077_v29, %v380_v27  ;;  %v470_v31 = vpop.f32.mrb[5].mxu1 }
 0x2df   :  { %v471_v32 = vadd.f32 %v470_v31, %v375_v28 }
 0x2e0   :  { %v490_v33 = vmax.f32 %v476_v30, 0.0 }
 0x2e1   :  { %v489_v35 = vmax.f32 %v471_v32, 0.0  ;;  %v1080_v36 = vpop.f32.mrb[6].mxu1 }
 0x2e2   :  { %v486_v38 = vadd.f32 %v1080_v36, %v390_v34  ;;  %v480_v39 = vpop.f32.mrb[7].mxu1 }
 0x2e3   :  { %v1191_v40 = vpack.c.bf16 %v490_v33, %v489_v35  ;;  %v481_v41 = vadd.f32 %v480_v39, %v385_v37 }
 0x2e4   :  { %v492_v42 = vmax.f32 %v486_v38, 0.0 }
 0x2e5   :  { %v491_v43 = vmax.f32 %v481_v41, 0.0  ;;  %1192 = vmatprep.subr.bf16.mxu1 %v1191_v40 }
 0x2e6   :  { %1194 = vmatpush3.bf16.msra.mxu1 %v1191_v40 }
 0x2e7   :  { %v1195_v44 = vpack.c.bf16 %v492_v42, %v491_v43 }
 0x2e9   :  { %1196 = vmatprep.subr.bf16.mxu1 %v1195_v44 }
 0x2ea   :  { %1198 = vmatpush3.bf16.msra.mxu1 %v1195_v44 }
 0x2eb   :  { %1200 = vmatprep.subr.bf16.mxu1 %v1199_v50 }
 0x2ed   :  { %1090 = vmatmul.mubr.msk.f32.vlgmr.msra.gmra.mrb[8].mxu1 %vm270_vm2, %v887_v45 }
 0x2ee   :  { %1092 = vmatprep.mubr.msk.f32.mxu1 %vm270_vm2, %v888_v46  ;;  %1202 = vmatpush3.bf16.msra.mxu1 %v1199_v50 }
 0x2ef   :  { %1204 = vmatprep.subr.bf16.mxu1 %v1203_v62 }
 0x2f1   :  { %1093 = vmatmul.mubr.msk.f32.gmra.mrb[10].mxu1 %vm270_vm2, %v889_v47 }
 0x2f2   :  { %1206 = vmatpush3.bf16.msra.mxu1 %v1203_v62 }
 0x3c0   :  { %v1091_v51 = vpop.f32.mrb[8].mxu1 }
 0x3c1   :  { %v591_v53 = vpop.f32.mrb[9].mxu1  ;;  %v597_v56 = vadd.f32 %v1091_v51, %v501_v55 }
 0x3c2   :  { %v592_v54 = vadd.f32 %v591_v53, %v496_v52 }
 0x3c3   :  { %v611_v0 = vmax.f32 %v597_v56, 0.0 }
 0x3c4   :  { %v610_v57 = vmax.f32 %v592_v54, 0.0  ;;  %v1094_v58 = vpop.f32.mrb[10].mxu1 }
 0x3c5   :  { %v601_v61 = vpop.f32.mrb[11].mxu1  ;;  %v607_v3 = vadd.f32 %v1094_v58, %v511_v2 }
 0x3c6   :  { %614 = vxpose.xlu0.b32.start [1/4] (short) %v610_v57, 128  ;;  %v602_v1 = vadd.f32 %v601_v61, %v506_v63 }
 0x3c7   :  { %v613_v5 = vmax.f32 %v607_v3, 0.0 }
 0x3c8   :  { %v612_v4 = vmax.f32 %v602_v1, 0.0 }
 0x3ca   :  { %615 = vxpose.xlu0.b32.cont [2/4] (short) %v611_v0, 128 }
 0x3ce   :  { %616 = vxpose.xlu0.b32.cont [3/4] (short) %v612_v4, 128 }
 0x3d2   :  { %617 = vxpose.xlu0.b32.end [4/4] (short) %v613_v5, 128 }
 0x446   :  { %v630_v6 = vpop.trf.xlu0 }
 0x447   :  { %1103 = vmatprep.mubr.msk.f32.mxu1 %vm270_vm2, %v630_v6 }
 0x44a   :  { %v631_v7 = vpop.trf.xlu0 }
 0x44b   :  { %1104 = vmatmul.mubr.msk.f32.vlgmr.msra.gmra.mrb[12].mxu1 %vm270_vm2, %v631_v7 }
 0x44e   :  { %v632_v8 = vpop.trf.xlu0 }
 0x44f   :  { %1106 = vmatprep.mubr.msk.f32.mxu1 %vm270_vm2, %v632_v8 }
 0x452   :  { %v633_v9 = vpop.trf.xlu0 }
 0x453   :  { %1107 = vmatmul.mubr.msk.f32.gmra.mrb[14].mxu1 %vm270_vm2, %v633_v9 }
 0x456   :  { %v634_v10 = vpop.trf.xlu0 }
 0x457   :  { %1109 = vmatprep.mubr.msk.f32.mxu1 %vm270_vm2, %v634_v10 }
 0x45a   :  { %v635_v11 = vpop.trf.xlu0 }
 0x45b   :  { %1110 = vmatmul.mubr.msk.f32.gmra.mrb[16].mxu1 %vm270_vm2, %v635_v11 }
 0x45e   :  { %v636_v12 = vpop.trf.xlu0 }
 0x45f   :  { %1112 = vmatprep.mubr.msk.f32.mxu1 %vm270_vm2, %v636_v12 }
 0x462   :  { %v637_v13 = vpop.trf.xlu0 }
 0x463   :  { %1113 = vmatmul.mubr.msk.f32.gmra.mrb[18].mxu1 %vm270_vm2, %v637_v13 }
 0x466   :  { %v638_v14 = vpop.trf.xlu0 }
 0x467   :  { %1115 = vmatprep.mubr.msk.f32.mxu1 %vm270_vm2, %v638_v14 }
 0x46a   :  { %v639_v15 = vpop.trf.xlu0 }
 0x46b   :  { %1116 = vmatmul.mubr.msk.f32.gmra.mrb[20].mxu1 %vm270_vm2, %v639_v15 }
 0x46e   :  { %v640_v16 = vpop.trf.xlu0 }
 0x46f   :  { %1118 = vmatprep.mubr.msk.f32.mxu1 %vm270_vm2, %v640_v16 }
 0x472   :  { %v641_v17 = vpop.trf.xlu0 }
 0x473   :  { %1119 = vmatmul.mubr.msk.f32.gmra.mrb[22].mxu1 %vm270_vm2, %v641_v17 }
 0x476   :  { %v642_v18 = vpop.trf.xlu0 }
 0x477   :  { %1121 = vmatprep.mubr.msk.f32.mxu1 %vm270_vm2, %v642_v18 }
 0x47a   :  { %v643_v19 = vpop.trf.xlu0 }
 0x47b   :  { %1122 = vmatmul.mubr.msk.f32.gmra.mrb[24].mxu1 %vm270_vm2, %v643_v19 }
 0x47e   :  { %v644_v20 = vpop.trf.xlu0 }
 0x47f   :  { %1124 = vmatprep.mubr.msk.f32.mxu1 %vm270_vm2, %v644_v20 }
 0x482   :  { %v645_v21 = vpop.trf.xlu0 }
 0x483   :  { %1125 = vmatmul.mubr.msk.f32.gmra.mrb[26].mxu1 %vm270_vm2, %v645_v21 }
 0x51e   :  { %v1105_v23 = vpop.f32.mrb[12].mxu1 }
 0x51f   :  { %v772_v24 = vadd.f32 %v1105_v23, %v934_v22  ;;  %v766_v25 = vpop.f32.mrb[13].mxu1 }
 0x520   :  { %v767_v26 = vadd.f32 %v934_v22, %v766_v25 }
 0x521   :  { %847 = vst.msk [vmem:[#allocation2 + $0x8] sm:$0xff] %vm845_vm3, %v772_v24 }
 0x522   :  { %846 = vst.msk [vmem:[#allocation2] sm:$0xff] %vm845_vm3, %v767_v26 }
 0x526   :  { %v1108_v27 = vpop.f32.mrb[14].mxu1 }
 0x527   :  { %v782_v28 = vadd.f32 %v1108_v27, %v934_v22  ;;  %v776_v29 = vpop.f32.mrb[15].mxu1 }
 0x528   :  { %v777_v30 = vadd.f32 %v934_v22, %v776_v29 }
 0x529   :  { %849 = vst.msk [vmem:[#allocation2 + $0x18] sm:$0xff] %vm845_vm3, %v782_v28 }
 0x52a   :  { %848 = vst.msk [vmem:[#allocation2 + $0x10] sm:$0xff] %vm845_vm3, %v777_v30 }
 0x52e   :  { %v1111_v31 = vpop.f32.mrb[16].mxu1 }
 0x52f   :  { %v792_v32 = vadd.f32 %v1111_v31, %v934_v22  ;;  %v786_v33 = vpop.f32.mrb[17].mxu1 }
 0x530   :  { %v787_v34 = vadd.f32 %v934_v22, %v786_v33 }
 0x531   :  { %851 = vst.msk [vmem:[#allocation2 + $0x28] sm:$0xff] %vm845_vm3, %v792_v32 }
 0x532   :  { %850 = vst.msk [vmem:[#allocation2 + $0x20] sm:$0xff] %vm845_vm3, %v787_v34 }
 0x536   :  { %v1114_v35 = vpop.f32.mrb[18].mxu1 }
 0x537   :  { %v802_v36 = vadd.f32 %v1114_v35, %v934_v22  ;;  %v796_v37 = vpop.f32.mrb[19].mxu1 }
 0x538   :  { %v797_v38 = vadd.f32 %v934_v22, %v796_v37 }
 0x539   :  { %853 = vst.msk [vmem:[#allocation2 + $0x38] sm:$0xff] %vm845_vm3, %v802_v36 }
 0x53a   :  { %852 = vst.msk [vmem:[#allocation2 + $0x30] sm:$0xff] %vm845_vm3, %v797_v38 }
 0x53e   :  { %v1117_v39 = vpop.f32.mrb[20].mxu1 }
 0x53f   :  { %v812_v40 = vadd.f32 %v1117_v39, %v934_v22  ;;  %v806_v41 = vpop.f32.mrb[21].mxu1 }
 0x540   :  { %v807_v42 = vadd.f32 %v934_v22, %v806_v41 }
 0x541   :  { %855 = vst.msk [vmem:[#allocation2 + $0x48] sm:$0xff] %vm845_vm3, %v812_v40 }
 0x542   :  { %854 = vst.msk [vmem:[#allocation2 + $0x40] sm:$0xff] %vm845_vm3, %v807_v42 }
 0x546   :  { %v1120_v43 = vpop.f32.mrb[22].mxu1 }
 0x547   :  { %v822_v44 = vadd.f32 %v1120_v43, %v934_v22  ;;  %v816_v45 = vpop.f32.mrb[23].mxu1 }
 0x548   :  { %v817_v46 = vadd.f32 %v934_v22, %v816_v45 }
 0x549   :  { %857 = vst.msk [vmem:[#allocation2 + $0x58] sm:$0xff] %vm845_vm3, %v822_v44 }
 0x54a   :  { %856 = vst.msk [vmem:[#allocation2 + $0x50] sm:$0xff] %vm845_vm3, %v817_v46 }
 0x54e   :  { %v1123_v47 = vpop.f32.mrb[24].mxu1 }
 0x54f   :  { %v832_v48 = vadd.f32 %v1123_v47, %v934_v22  ;;  %v826_v49 = vpop.f32.mrb[25].mxu1 }
 0x550   :  { %v827_v50 = vadd.f32 %v934_v22, %v826_v49 }
 0x551   :  { %859 = vst.msk [vmem:[#allocation2 + $0x68] sm:$0xff] %vm845_vm3, %v832_v48 }
 0x552   :  { %858 = vst.msk [vmem:[#allocation2 + $0x60] sm:$0xff] %vm845_vm3, %v827_v50 }
 0x556   :  { %v1126_v51 = vpop.f32.mrb[26].mxu1 }
 0x557   :  { %v842_v52 = vadd.f32 %v1126_v51, %v934_v22  ;;  %v836_v53 = vpop.f32.mrb[27].mxu1 }
 0x558   :  { %v837_v54 = vadd.f32 %v934_v22, %v836_v53 }
 0x559   :  { %861 = vst.msk [vmem:[#allocation2 + $0x78] sm:$0xff] %vm845_vm3, %v842_v52 }
 0x55a   :  { %860 = vst.msk [vmem:[#allocation2 + $0x70] sm:$0xff] %vm845_vm3, %v837_v54 }
 0x55b   :  { %866 = vsyncadd [#allocation3], 1792  ;;  %s1239_s4 = smov [#allocation2]  }
 0x55c   :  { %s867_s18 = sshll.u32 %s1239_s4, 4  ;;  %s868_s18 = int_to_ptr.vmem [resolvable:$true] %s867_s18 }
 0x55d   :  { %s1214_s19 = scalar_lea.vmem %s868_s18, 256  ;;  %s1218_s20 = scalar_lea.vmem %s868_s18, 2048 }
 0x55e   :  { %p1215_p0 = scmp.ne.s32.totalorder %s868_s18, %s1214_s19  ;;  %p1219_p1 = scmp.lt.s32.totalorder %s868_s18, %s868_s18 }
 0x55f   :  { %p1220_p2 = scmp.lt.s32.totalorder %s1218_s20, %s1214_s19 }
 0x561   :  { %p1221_p3 = por %p1220_p2, %p1219_p1 }
 0x563   :  { %p1222_p4 = pnand %p1221_p3, %p1215_p0 }
 0x565   :  { %1225 = shalt.err (!%p1222_p4)
}
 0x566   :  { %s1226_s23 = scalar_lea.hbm %s1534_s5, 256 }
 0x567   :  { %p1227_p5 = scmp.ne.s32.totalorder %s1534_s5, %s1226_s23  ;;  %p1230_p6 = scmp.lt.u32.totalorder %s1226_s23, %s1534_s5 }
 0x569   :  { %p1232_p7 = pnand %p1230_p6, %p1227_p5 }
 0x56b   :  { %1235 = shalt.err (!%p1232_p7)
}
 0x56c   :  { %s1240_s28 = smov 128   ;;  %s1241_s29 = smov 8  }
 0x56d   :  { %873 = dma.vmem_to_hbm [thread:$0]  %s868_s18, 256, %s1534_s5, [#allocation3], %s1240_s28, %s1240_s28, %s1241_s29  }
 0x56e   :  { %1236 = dma.done.wait [#allocation3], 2048  }
 0x56f   :  { %1237 = vsyncadd [#allocation3], 4294965248 }
 0x570   :  { %877 = vsyncpa [#allocation3], 1 }

</bundles_post_ra>
